<compile_context>
chip_gen: v5e
topology: v5e:2x2
jax: 0.10.0
libtpu: 0.0.40
codegen_flags: <defaults>
</compile_context>

<pallas_src>
import math

import jax
import jax.numpy as jnp
from jax import lax
from jax.experimental import pallas as pl
from jax.experimental.pallas import tpu as pltpu

V_F_LEN = 16
I_F_LEN = 16
EMBED = V_F_LEN + I_F_LEN          # 32
NUM_HEADS = 2
HEAD_DIM = EMBED // NUM_HEADS      # 16
SEQ = 8
BATCH = 2


def _efa_kernel(v_ref, i_ref, pos_ref, wqkv_ref, bqkv_ref, wo_ref, bo_ref, out_ref):
    """Single-step fused forward for the whole (L, N) problem.

    v_ref:    (L, N, V_F_LEN)   seq-first, native layout
    i_ref:    (L, N, I_F_LEN)
    pos_ref:  (1, E)            learned position embedding (seq_len = 1)
    wqkv_ref: (3*H, E, hd)      per-head in-proj weights, index = which*H + h (which: 0=q, 1=k, 2=v)
    bqkv_ref: (3*H, 1, hd)      per-head in-proj biases (same index layout)
    wo_ref:   (H, hd, E)        per-head row-blocks of the out-proj weight
    bo_ref:   (1, E)            out-proj bias
    out_ref:  (L, N, E)
    """
    v_all = v_ref[...]                 # (L, N, VF)
    i_all = i_ref[...]                 # (L, N, IF)
    pos = pos_ref[...]                 # (1, E)
    wqkv = wqkv_ref[...]               # (3H, E, hd)
    bqkv = bqkv_ref[...]               # (3H, 1, hd)
    wo = wo_ref[...]                   # (H, hd, E)
    bo = bo_ref[...]                   # (1, E)

    scale = 1.0 / math.sqrt(HEAD_DIM)
    outs = []
    for n in range(BATCH):             # static unroll over the tiny batch (BATCH == 2)
        # raw concatenated features for batch element n (residual source)
        x_n = jnp.concatenate([v_all[:, n, :], i_all[:, n, :]], axis=-1)   # (L, E)
        xp = x_n + pos                                                     # + learned pos embed

        # start the accumulator with residual + out-proj bias:
        #   out = sum_h (attn_h @ Wo_h) + b_o + concat_vi
        o_n = x_n + bo                                                     # (L, E)

        for h in range(NUM_HEADS):     # static unroll; per-head weight blocks -> no lane slicing
            wq = wqkv[0 * NUM_HEADS + h]
            wk = wqkv[1 * NUM_HEADS + h]
            wv = wqkv[2 * NUM_HEADS + h]
            q = jnp.dot(xp, wq, preferred_element_type=jnp.float32) + bqkv[0 * NUM_HEADS + h]
            k = jnp.dot(xp, wk, preferred_element_type=jnp.float32) + bqkv[1 * NUM_HEADS + h]
            v = jnp.dot(xp, wv, preferred_element_type=jnp.float32) + bqkv[2 * NUM_HEADS + h]

            # scores: K-"transpose" folded into the contraction (no materialized transpose)
            s = lax.dot_general(q * scale, k, (((1,), (1,)), ((), ())),
                                preferred_element_type=jnp.float32)        # (L, L)
            s = s - jnp.max(s, axis=-1, keepdims=True)
            p = jnp.exp(s)
            p = p * pl.reciprocal(jnp.sum(p, axis=-1, keepdims=True), approx=True)

            attn_h = jnp.dot(p, v, preferred_element_type=jnp.float32)     # (L, hd)
            # out-projection decomposed per head: concat(heads) @ Wo == sum_h attn_h @ Wo[h]
            o_n = o_n + jnp.dot(attn_h, wo[h], preferred_element_type=jnp.float32)

        outs.append(o_n)

    # single lane-dense store of the whole (L, N, E) result
    out_ref[...] = jnp.stack(outs, axis=1).astype(out_ref.dtype)


def early_fusion_attention(v_features, i_features, kparams):
    """v_features: (L, N, v_f_len); i_features: (L, N, i_f_len). Returns (L, N, E).
    No wrapper-side concat / transpose: all layout work happens in the single-step kernel."""
    L, N, _ = v_features.shape
    E, H, hd = EMBED, NUM_HEADS, HEAD_DIM
    return pl.pallas_call(
        _efa_kernel,
        out_shape=jax.ShapeDtypeStruct((L, N, E), v_features.dtype),
        grid=(1,),
        in_specs=[
            pl.BlockSpec((L, N, V_F_LEN), lambda b: (0, 0, 0)),    # v_features (full)
            pl.BlockSpec((L, N, I_F_LEN), lambda b: (0, 0, 0)),    # i_features (full)
            pl.BlockSpec((1, E), lambda b: (0, 0)),                # pos_embed
            pl.BlockSpec((3 * H, E, hd), lambda b: (0, 0, 0)),     # per-head qkv weights
            pl.BlockSpec((3 * H, 1, hd), lambda b: (0, 0, 0)),     # per-head qkv biases
            pl.BlockSpec((H, hd, E), lambda b: (0, 0, 0)),         # per-head out-proj blocks
            pl.BlockSpec((1, E), lambda b: (0, 0)),                # out-proj bias
        ],
        out_specs=pl.BlockSpec((L, N, E), lambda b: (0, 0, 0)),
        compiler_params=pltpu.CompilerParams(dimension_semantics=("arbitrary",)),
    )(v_features, i_features, kparams["pos_embed"], kparams["w_qkv_h"],
      kparams["b_qkv_h"], kparams["w_out_h"], kparams["b_out"])


def init_params(key):
    """Deterministic synthetic init mirroring the PyTorch shapes.
    Fused weights are stored pre-transposed so projections are x @ W:
      w_qkv (E, 3E)  <->  nn.MultiheadAttention.in_proj_weight.T   (columns: [Q | K | V])
      w_out (E, E)   <->  out_proj.weight.T
    """
    k_pos, k_qkv, k_bq, k_wo, k_bo = jax.random.split(key, 5)
    pos_embed = jax.random.normal(k_pos, (1, EMBED), jnp.float32) * math.sqrt(2.0 / EMBED)
    lim_in = math.sqrt(6.0 / (EMBED + 3 * EMBED))
    w_qkv = jax.random.uniform(k_qkv, (EMBED, 3 * EMBED), jnp.float32, -lim_in, lim_in)
    b_qkv = 0.01 * jax.random.normal(k_bq, (1, 3 * EMBED), jnp.float32)
    lim_out = math.sqrt(1.0 / EMBED)
    w_out = jax.random.uniform(k_wo, (EMBED, EMBED), jnp.float32, -lim_out, lim_out)
    b_out = 0.01 * jax.random.normal(k_bo, (1, EMBED), jnp.float32)
    return {"pos_embed": pos_embed, "w_qkv": w_qkv, "b_qkv": b_qkv,
            "w_out": w_out, "b_out": b_out}


def pack_kernel_params(params):
    """One-time (init / checkpoint-load time) repack of the fused weights into per-head
    blocks indexed along a leading axis, so the kernel never slices at sub-128-lane offsets:
      w_qkv_h[which*H + h] = w_qkv[:, which*E + h*hd : which*E + (h+1)*hd]   -> (E, hd)
      b_qkv_h[which*H + h] = b_qkv[:, which*E + h*hd : which*E + (h+1)*hd]   -> (1, hd)
      w_out_h[h]           = w_out[h*hd:(h+1)*hd, :]                          -> (hd, E)
    """
    E, H, hd = EMBED, NUM_HEADS, HEAD_DIM
    w_qkv_h = params["w_qkv"].reshape(E, 3, H, hd).transpose(1, 2, 0, 3).reshape(3 * H, E, hd)
    b_qkv_h = params["b_qkv"].reshape(1, 3, H, hd).transpose(1, 2, 0, 3).reshape(3 * H, 1, hd)
    w_out_h = params["w_out"].reshape(H, hd, E)
    return {"pos_embed": params["pos_embed"], "w_qkv_h": w_qkv_h, "b_qkv_h": b_qkv_h,
            "w_out_h": w_out_h, "b_out": params["b_out"]}


def reference(v_features, i_features, params):
    """Pure-JAX reference of the same forward pass, using the fused (PyTorch-like) params."""
    concat = jnp.concatenate([v_features, i_features], axis=-1)     # (L, N, E)
    x = concat + params["pos_embed"]
    L, N, E = x.shape
    qkv = jnp.einsum("lne,ef->lnf", x, params["w_qkv"]) + params["b_qkv"]
    q, k, v = qkv[..., :E], qkv[..., E:2 * E], qkv[..., 2 * E:]
    qh = q.reshape(L, N, NUM_HEADS, HEAD_DIM)
    kh = k.reshape(L, N, NUM_HEADS, HEAD_DIM)
    vh = v.reshape(L, N, NUM_HEADS, HEAD_DIM)
    s = jnp.einsum("lnhd,mnhd->nhlm", qh, kh) / math.sqrt(HEAD_DIM)
    p = jax.nn.softmax(s, axis=-1)
    o = jnp.einsum("nhlm,mnhd->lnhd", p, vh).reshape(L, N, E)
    out = jnp.einsum("lne,ef->lnf", o, params["w_out"]) + params["b_out"]
    return out + concat


if __name__ == "__main__":
    key = jax.random.PRNGKey(0)
    k_v, k_i, k_p = jax.random.split(key, 3)
    v_features = jax.random.normal(k_v, (SEQ, BATCH, V_F_LEN), jnp.float32)
    i_features = jax.random.normal(k_i, (SEQ, BATCH, I_F_LEN), jnp.float32)
    params = init_params(k_p)
    kparams = pack_kernel_params(params)   # one-time repack, outside the per-call path

    out = jax.block_until_ready(early_fusion_attention(v_features, i_features, kparams))
    assert out.shape == (SEQ, BATCH, EMBED)

    ref = reference(v_features, i_features, params)
    if not jnp.allclose(out, ref, rtol=2e-2, atol=2e-2):
        raise AssertionError("Pallas kernel output does not match pure-JAX reference")

    print("KERNEL_OK")
</pallas_src>

<mosaic_0001>
module attributes {stable_mosaic.version = 11 : i64} {
  func.func @_efa_kernel(%arg0: i32, %arg1: memref<8x2x16xf32, #tpu.memory_space<vmem>>, %arg2: memref<8x2x16xf32, #tpu.memory_space<vmem>>, %arg3: memref<1x32xf32, #tpu.memory_space<vmem>>, %arg4: memref<6x32x16xf32, #tpu.memory_space<vmem>>, %arg5: memref<6x1x16xf32, #tpu.memory_space<vmem>>, %arg6: memref<2x16x32xf32, #tpu.memory_space<vmem>>, %arg7: memref<1x32xf32, #tpu.memory_space<vmem>>, %arg8: memref<8x2x32xf32, #tpu.memory_space<vmem>>) attributes {dimension_semantics = [#tpu.dimension_semantics<arbitrary>], iteration_bounds = array<i64: 1>, scalar_prefetch = 0 : i64, scratch_operands = 0 : i64, tpu.core_type = #tpu.core_type<tc>, window_params = [{pipeline_mode = #tpu.pipeline_mode<synchronous>, transform_indices = @transform_0, window_bounds = array<i64: 8, 2, 16>}, {pipeline_mode = #tpu.pipeline_mode<synchronous>, transform_indices = @transform_1, window_bounds = array<i64: 8, 2, 16>}, {pipeline_mode = #tpu.pipeline_mode<synchronous>, transform_indices = @transform_2, window_bounds = array<i64: 1, 32>}, {pipeline_mode = #tpu.pipeline_mode<synchronous>, transform_indices = @transform_3, window_bounds = array<i64: 6, 32, 16>}, {pipeline_mode = #tpu.pipeline_mode<synchronous>, transform_indices = @transform_4, window_bounds = array<i64: 6, 1, 16>}, {pipeline_mode = #tpu.pipeline_mode<synchronous>, transform_indices = @transform_5, window_bounds = array<i64: 2, 16, 32>}, {pipeline_mode = #tpu.pipeline_mode<synchronous>, transform_indices = @transform_6, window_bounds = array<i64: 1, 32>}, {pipeline_mode = #tpu.pipeline_mode<synchronous>, transform_indices = @transform_7, window_bounds = array<i64: 8, 2, 32>}]} {
    %c0 = arith.constant 0 : index
    %c0_0 = arith.constant 0 : index
    %c0_1 = arith.constant 0 : index
    %0 = vector.load %arg1[%c0, %c0_0, %c0_1] : memref<8x2x16xf32, #tpu.memory_space<vmem>>, vector<8x2x16xf32>
    %c0_2 = arith.constant 0 : index
    %c0_3 = arith.constant 0 : index
    %c0_4 = arith.constant 0 : index
    %1 = vector.load %arg2[%c0_2, %c0_3, %c0_4] : memref<8x2x16xf32, #tpu.memory_space<vmem>>, vector<8x2x16xf32>
    %c0_5 = arith.constant 0 : index
    %c0_6 = arith.constant 0 : index
    %2 = vector.load %arg3[%c0_5, %c0_6] : memref<1x32xf32, #tpu.memory_space<vmem>>, vector<1x32xf32>
    %c0_7 = arith.constant 0 : index
    %c0_8 = arith.constant 0 : index
    %c0_9 = arith.constant 0 : index
    %3 = vector.load %arg4[%c0_7, %c0_8, %c0_9] : memref<6x32x16xf32, #tpu.memory_space<vmem>>, vector<6x32x16xf32>
    %c0_10 = arith.constant 0 : index
    %c0_11 = arith.constant 0 : index
    %c0_12 = arith.constant 0 : index
    %4 = vector.load %arg5[%c0_10, %c0_11, %c0_12] : memref<6x1x16xf32, #tpu.memory_space<vmem>>, vector<6x1x16xf32>
    %c0_13 = arith.constant 0 : index
    %c0_14 = arith.constant 0 : index
    %c0_15 = arith.constant 0 : index
    %5 = vector.load %arg6[%c0_13, %c0_14, %c0_15] : memref<2x16x32xf32, #tpu.memory_space<vmem>>, vector<2x16x32xf32>
    %c0_16 = arith.constant 0 : index
    %c0_17 = arith.constant 0 : index
    %6 = vector.load %arg7[%c0_16, %c0_17] : memref<1x32xf32, #tpu.memory_space<vmem>>, vector<1x32xf32>
    %7 = vector.extract_strided_slice %0 {offsets = [0, 0, 0], sizes = [8, 1, 16], strides = [1, 1, 1]} : vector<8x2x16xf32> to vector<8x1x16xf32>
    %8 = vector.shape_cast %7 : vector<8x1x16xf32> to vector<8x16xf32>
    %9 = vector.extract_strided_slice %1 {offsets = [0, 0, 0], sizes = [8, 1, 16], strides = [1, 1, 1]} : vector<8x2x16xf32> to vector<8x1x16xf32>
    %10 = vector.shape_cast %9 : vector<8x1x16xf32> to vector<8x16xf32>
    %11 = tpu.concatenate %8, %10 in 1 : vector<8x16xf32>, vector<8x16xf32> -> vector<8x32xf32>
    %12 = vector.broadcast %2 : vector<1x32xf32> to vector<8x32xf32>
    %13 = arith.addf %11, %12 : vector<8x32xf32>
    %14 = vector.broadcast %6 : vector<1x32xf32> to vector<8x32xf32>
    %15 = arith.addf %11, %14 : vector<8x32xf32>
    %16 = vector.extract_strided_slice %3 {offsets = [0, 0, 0], sizes = [1, 32, 16], strides = [1, 1, 1]} : vector<6x32x16xf32> to vector<1x32x16xf32>
    %17 = vector.shape_cast %16 : vector<1x32x16xf32> to vector<32x16xf32>
    %18 = vector.extract_strided_slice %3 {offsets = [2, 0, 0], sizes = [1, 32, 16], strides = [1, 1, 1]} : vector<6x32x16xf32> to vector<1x32x16xf32>
    %19 = vector.shape_cast %18 : vector<1x32x16xf32> to vector<32x16xf32>
    %20 = vector.extract_strided_slice %3 {offsets = [4, 0, 0], sizes = [1, 32, 16], strides = [1, 1, 1]} : vector<6x32x16xf32> to vector<1x32x16xf32>
    %21 = vector.shape_cast %20 : vector<1x32x16xf32> to vector<32x16xf32>
    %cst = arith.constant dense<0.000000e+00> : vector<8x16xf32>
    %22 = tpu.matmul %13, %17, %cst {dimension_numbers = #tpu.dot_dimension_numbers<[1], [0], [0], [1], [0, 0, 1, 1], [], []>} : vector<8x32xf32>, vector<32x16xf32>, vector<8x16xf32> -> vector<8x16xf32>
    %23 = vector.extract_strided_slice %4 {offsets = [0, 0, 0], sizes = [1, 1, 16], strides = [1, 1, 1]} : vector<6x1x16xf32> to vector<1x1x16xf32>
    %24 = vector.shape_cast %23 : vector<1x1x16xf32> to vector<1x16xf32>
    %25 = vector.broadcast %24 : vector<1x16xf32> to vector<8x16xf32>
    %26 = arith.addf %22, %25 : vector<8x16xf32>
    %cst_18 = arith.constant dense<0.000000e+00> : vector<8x16xf32>
    %27 = tpu.matmul %13, %19, %cst_18 {dimension_numbers = #tpu.dot_dimension_numbers<[1], [0], [0], [1], [0, 0, 1, 1], [], []>} : vector<8x32xf32>, vector<32x16xf32>, vector<8x16xf32> -> vector<8x16xf32>
    %28 = vector.extract_strided_slice %4 {offsets = [2, 0, 0], sizes = [1, 1, 16], strides = [1, 1, 1]} : vector<6x1x16xf32> to vector<1x1x16xf32>
    %29 = vector.shape_cast %28 : vector<1x1x16xf32> to vector<1x16xf32>
    %30 = vector.broadcast %29 : vector<1x16xf32> to vector<8x16xf32>
    %31 = arith.addf %27, %30 : vector<8x16xf32>
    %cst_19 = arith.constant dense<0.000000e+00> : vector<8x16xf32>
    %32 = tpu.matmul %13, %21, %cst_19 {dimension_numbers = #tpu.dot_dimension_numbers<[1], [0], [0], [1], [0, 0, 1, 1], [], []>} : vector<8x32xf32>, vector<32x16xf32>, vector<8x16xf32> -> vector<8x16xf32>
    %33 = vector.extract_strided_slice %4 {offsets = [4, 0, 0], sizes = [1, 1, 16], strides = [1, 1, 1]} : vector<6x1x16xf32> to vector<1x1x16xf32>
    %34 = vector.shape_cast %33 : vector<1x1x16xf32> to vector<1x16xf32>
    %35 = vector.broadcast %34 : vector<1x16xf32> to vector<8x16xf32>
    %36 = arith.addf %32, %35 : vector<8x16xf32>
    %cst_20 = arith.constant 2.500000e-01 : f32
    %37 = vector.broadcast %cst_20 : f32 to vector<8x16xf32>
    %38 = arith.mulf %26, %37 : vector<8x16xf32>
    %cst_21 = arith.constant dense<0.000000e+00> : vector<8x8xf32>
    %39 = tpu.matmul %38, %31, %cst_21 {dimension_numbers = #tpu.dot_dimension_numbers<[1], [1], [0], [0], [0, 0, 1, 0], [], []>} : vector<8x16xf32>, vector<8x16xf32>, vector<8x8xf32> -> vector<8x8xf32>
    %cst_22 = arith.constant dense<0xFF800000> : vector<8xf32>
    %40 = vector.multi_reduction <maximumf>, %39, %cst_22 [1] : vector<8x8xf32> to vector<8xf32>
    %41 = vector.shape_cast %40 : vector<8xf32> to vector<8x1xf32>
    %42 = vector.broadcast %41 : vector<8x1xf32> to vector<8x8xf32>
    %43 = arith.subf %39, %42 : vector<8x8xf32>
    %44 = math.exp %43 : vector<8x8xf32>
    %cst_23 = arith.constant dense<0.000000e+00> : vector<8xf32>
    %45 = vector.multi_reduction <add>, %44, %cst_23 [1] : vector<8x8xf32> to vector<8xf32>
    %46 = vector.shape_cast %45 : vector<8xf32> to vector<8x1xf32>
    %47 = tpu.reciprocal %46 {approx = true} : vector<8x1xf32> -> vector<8x1xf32>
    %48 = vector.broadcast %47 : vector<8x1xf32> to vector<8x8xf32>
    %49 = arith.mulf %44, %48 : vector<8x8xf32>
    %cst_24 = arith.constant dense<0.000000e+00> : vector<8x16xf32>
    %50 = tpu.matmul %49, %36, %cst_24 {dimension_numbers = #tpu.dot_dimension_numbers<[1], [0], [0], [1], [0, 0, 1, 1], [], []>} : vector<8x8xf32>, vector<8x16xf32>, vector<8x16xf32> -> vector<8x16xf32>
    %51 = vector.extract_strided_slice %5 {offsets = [0, 0, 0], sizes = [1, 16, 32], strides = [1, 1, 1]} : vector<2x16x32xf32> to vector<1x16x32xf32>
    %52 = vector.shape_cast %51 : vector<1x16x32xf32> to vector<16x32xf32>
    %cst_25 = arith.constant dense<0.000000e+00> : vector<8x32xf32>
    %53 = tpu.matmul %50, %52, %cst_25 {dimension_numbers = #tpu.dot_dimension_numbers<[1], [0], [0], [1], [0, 0, 1, 1], [], []>} : vector<8x16xf32>, vector<16x32xf32>, vector<8x32xf32> -> vector<8x32xf32>
    %54 = arith.addf %15, %53 : vector<8x32xf32>
    %55 = vector.extract_strided_slice %3 {offsets = [1, 0, 0], sizes = [1, 32, 16], strides = [1, 1, 1]} : vector<6x32x16xf32> to vector<1x32x16xf32>
    %56 = vector.shape_cast %55 : vector<1x32x16xf32> to vector<32x16xf32>
    %57 = vector.extract_strided_slice %3 {offsets = [3, 0, 0], sizes = [1, 32, 16], strides = [1, 1, 1]} : vector<6x32x16xf32> to vector<1x32x16xf32>
    %58 = vector.shape_cast %57 : vector<1x32x16xf32> to vector<32x16xf32>
    %59 = vector.extract_strided_slice %3 {offsets = [5, 0, 0], sizes = [1, 32, 16], strides = [1, 1, 1]} : vector<6x32x16xf32> to vector<1x32x16xf32>
    %60 = vector.shape_cast %59 : vector<1x32x16xf32> to vector<32x16xf32>
    %cst_26 = arith.constant dense<0.000000e+00> : vector<8x16xf32>
    %61 = tpu.matmul %13, %56, %cst_26 {dimension_numbers = #tpu.dot_dimension_numbers<[1], [0], [0], [1], [0, 0, 1, 1], [], []>} : vector<8x32xf32>, vector<32x16xf32>, vector<8x16xf32> -> vector<8x16xf32>
    %62 = vector.extract_strided_slice %4 {offsets = [1, 0, 0], sizes = [1, 1, 16], strides = [1, 1, 1]} : vector<6x1x16xf32> to vector<1x1x16xf32>
    %63 = vector.shape_cast %62 : vector<1x1x16xf32> to vector<1x16xf32>
    %64 = vector.broadcast %63 : vector<1x16xf32> to vector<8x16xf32>
    %65 = arith.addf %61, %64 : vector<8x16xf32>
    %cst_27 = arith.constant dense<0.000000e+00> : vector<8x16xf32>
    %66 = tpu.matmul %13, %58, %cst_27 {dimension_numbers = #tpu.dot_dimension_numbers<[1], [0], [0], [1], [0, 0, 1, 1], [], []>} : vector<8x32xf32>, vector<32x16xf32>, vector<8x16xf32> -> vector<8x16xf32>
    %67 = vector.extract_strided_slice %4 {offsets = [3, 0, 0], sizes = [1, 1, 16], strides = [1, 1, 1]} : vector<6x1x16xf32> to vector<1x1x16xf32>
    %68 = vector.shape_cast %67 : vector<1x1x16xf32> to vector<1x16xf32>
    %69 = vector.broadcast %68 : vector<1x16xf32> to vector<8x16xf32>
    %70 = arith.addf %66, %69 : vector<8x16xf32>
    %cst_28 = arith.constant dense<0.000000e+00> : vector<8x16xf32>
    %71 = tpu.matmul %13, %60, %cst_28 {dimension_numbers = #tpu.dot_dimension_numbers<[1], [0], [0], [1], [0, 0, 1, 1], [], []>} : vector<8x32xf32>, vector<32x16xf32>, vector<8x16xf32> -> vector<8x16xf32>
    %72 = vector.extract_strided_slice %4 {offsets = [5, 0, 0], sizes = [1, 1, 16], strides = [1, 1, 1]} : vector<6x1x16xf32> to vector<1x1x16xf32>
    %73 = vector.shape_cast %72 : vector<1x1x16xf32> to vector<1x16xf32>
    %74 = vector.broadcast %73 : vector<1x16xf32> to vector<8x16xf32>
    %75 = arith.addf %71, %74 : vector<8x16xf32>
    %cst_29 = arith.constant 2.500000e-01 : f32
    %76 = vector.broadcast %cst_29 : f32 to vector<8x16xf32>
    %77 = arith.mulf %65, %76 : vector<8x16xf32>
    %cst_30 = arith.constant dense<0.000000e+00> : vector<8x8xf32>
    %78 = tpu.matmul %77, %70, %cst_30 {dimension_numbers = #tpu.dot_dimension_numbers<[1], [1], [0], [0], [0, 0, 1, 0], [], []>} : vector<8x16xf32>, vector<8x16xf32>, vector<8x8xf32> -> vector<8x8xf32>
    %cst_31 = arith.constant dense<0xFF800000> : vector<8xf32>
    %79 = vector.multi_reduction <maximumf>, %78, %cst_31 [1] : vector<8x8xf32> to vector<8xf32>
    %80 = vector.shape_cast %79 : vector<8xf32> to vector<8x1xf32>
    %81 = vector.broadcast %80 : vector<8x1xf32> to vector<8x8xf32>
    %82 = arith.subf %78, %81 : vector<8x8xf32>
    %83 = math.exp %82 : vector<8x8xf32>
    %cst_32 = arith.constant dense<0.000000e+00> : vector<8xf32>
    %84 = vector.multi_reduction <add>, %83, %cst_32 [1] : vector<8x8xf32> to vector<8xf32>
    %85 = vector.shape_cast %84 : vector<8xf32> to vector<8x1xf32>
    %86 = tpu.reciprocal %85 {approx = true} : vector<8x1xf32> -> vector<8x1xf32>
    %87 = vector.broadcast %86 : vector<8x1xf32> to vector<8x8xf32>
    %88 = arith.mulf %83, %87 : vector<8x8xf32>
    %cst_33 = arith.constant dense<0.000000e+00> : vector<8x16xf32>
    %89 = tpu.matmul %88, %75, %cst_33 {dimension_numbers = #tpu.dot_dimension_numbers<[1], [0], [0], [1], [0, 0, 1, 1], [], []>} : vector<8x8xf32>, vector<8x16xf32>, vector<8x16xf32> -> vector<8x16xf32>
    %90 = vector.extract_strided_slice %5 {offsets = [1, 0, 0], sizes = [1, 16, 32], strides = [1, 1, 1]} : vector<2x16x32xf32> to vector<1x16x32xf32>
    %91 = vector.shape_cast %90 : vector<1x16x32xf32> to vector<16x32xf32>
    %cst_34 = arith.constant dense<0.000000e+00> : vector<8x32xf32>
    %92 = tpu.matmul %89, %91, %cst_34 {dimension_numbers = #tpu.dot_dimension_numbers<[1], [0], [0], [1], [0, 0, 1, 1], [], []>} : vector<8x16xf32>, vector<16x32xf32>, vector<8x32xf32> -> vector<8x32xf32>
    %93 = arith.addf %54, %92 : vector<8x32xf32>
    %94 = vector.extract_strided_slice %0 {offsets = [0, 1, 0], sizes = [8, 1, 16], strides = [1, 1, 1]} : vector<8x2x16xf32> to vector<8x1x16xf32>
    %95 = vector.shape_cast %94 : vector<8x1x16xf32> to vector<8x16xf32>
    %96 = vector.extract_strided_slice %1 {offsets = [0, 1, 0], sizes = [8, 1, 16], strides = [1, 1, 1]} : vector<8x2x16xf32> to vector<8x1x16xf32>
    %97 = vector.shape_cast %96 : vector<8x1x16xf32> to vector<8x16xf32>
    %98 = tpu.concatenate %95, %97 in 1 : vector<8x16xf32>, vector<8x16xf32> -> vector<8x32xf32>
    %99 = vector.broadcast %2 : vector<1x32xf32> to vector<8x32xf32>
    %100 = arith.addf %98, %99 : vector<8x32xf32>
    %101 = vector.broadcast %6 : vector<1x32xf32> to vector<8x32xf32>
    %102 = arith.addf %98, %101 : vector<8x32xf32>
    %103 = vector.extract_strided_slice %3 {offsets = [0, 0, 0], sizes = [1, 32, 16], strides = [1, 1, 1]} : vector<6x32x16xf32> to vector<1x32x16xf32>
    %104 = vector.shape_cast %103 : vector<1x32x16xf32> to vector<32x16xf32>
    %105 = vector.extract_strided_slice %3 {offsets = [2, 0, 0], sizes = [1, 32, 16], strides = [1, 1, 1]} : vector<6x32x16xf32> to vector<1x32x16xf32>
    %106 = vector.shape_cast %105 : vector<1x32x16xf32> to vector<32x16xf32>
    %107 = vector.extract_strided_slice %3 {offsets = [4, 0, 0], sizes = [1, 32, 16], strides = [1, 1, 1]} : vector<6x32x16xf32> to vector<1x32x16xf32>
    %108 = vector.shape_cast %107 : vector<1x32x16xf32> to vector<32x16xf32>
    %cst_35 = arith.constant dense<0.000000e+00> : vector<8x16xf32>
    %109 = tpu.matmul %100, %104, %cst_35 {dimension_numbers = #tpu.dot_dimension_numbers<[1], [0], [0], [1], [0, 0, 1, 1], [], []>} : vector<8x32xf32>, vector<32x16xf32>, vector<8x16xf32> -> vector<8x16xf32>
    %110 = vector.extract_strided_slice %4 {offsets = [0, 0, 0], sizes = [1, 1, 16], strides = [1, 1, 1]} : vector<6x1x16xf32> to vector<1x1x16xf32>
    %111 = vector.shape_cast %110 : vector<1x1x16xf32> to vector<1x16xf32>
    %112 = vector.broadcast %111 : vector<1x16xf32> to vector<8x16xf32>
    %113 = arith.addf %109, %112 : vector<8x16xf32>
    %cst_36 = arith.constant dense<0.000000e+00> : vector<8x16xf32>
    %114 = tpu.matmul %100, %106, %cst_36 {dimension_numbers = #tpu.dot_dimension_numbers<[1], [0], [0], [1], [0, 0, 1, 1], [], []>} : vector<8x32xf32>, vector<32x16xf32>, vector<8x16xf32> -> vector<8x16xf32>
    %115 = vector.extract_strided_slice %4 {offsets = [2, 0, 0], sizes = [1, 1, 16], strides = [1, 1, 1]} : vector<6x1x16xf32> to vector<1x1x16xf32>
    %116 = vector.shape_cast %115 : vector<1x1x16xf32> to vector<1x16xf32>
    %117 = vector.broadcast %116 : vector<1x16xf32> to vector<8x16xf32>
    %118 = arith.addf %114, %117 : vector<8x16xf32>
    %cst_37 = arith.constant dense<0.000000e+00> : vector<8x16xf32>
    %119 = tpu.matmul %100, %108, %cst_37 {dimension_numbers = #tpu.dot_dimension_numbers<[1], [0], [0], [1], [0, 0, 1, 1], [], []>} : vector<8x32xf32>, vector<32x16xf32>, vector<8x16xf32> -> vector<8x16xf32>
    %120 = vector.extract_strided_slice %4 {offsets = [4, 0, 0], sizes = [1, 1, 16], strides = [1, 1, 1]} : vector<6x1x16xf32> to vector<1x1x16xf32>
    %121 = vector.shape_cast %120 : vector<1x1x16xf32> to vector<1x16xf32>
    %122 = vector.broadcast %121 : vector<1x16xf32> to vector<8x16xf32>
    %123 = arith.addf %119, %122 : vector<8x16xf32>
    %cst_38 = arith.constant 2.500000e-01 : f32
    %124 = vector.broadcast %cst_38 : f32 to vector<8x16xf32>
    %125 = arith.mulf %113, %124 : vector<8x16xf32>
    %cst_39 = arith.constant dense<0.000000e+00> : vector<8x8xf32>
    %126 = tpu.matmul %125, %118, %cst_39 {dimension_numbers = #tpu.dot_dimension_numbers<[1], [1], [0], [0], [0, 0, 1, 0], [], []>} : vector<8x16xf32>, vector<8x16xf32>, vector<8x8xf32> -> vector<8x8xf32>
    %cst_40 = arith.constant dense<0xFF800000> : vector<8xf32>
    %127 = vector.multi_reduction <maximumf>, %126, %cst_40 [1] : vector<8x8xf32> to vector<8xf32>
    %128 = vector.shape_cast %127 : vector<8xf32> to vector<8x1xf32>
    %129 = vector.broadcast %128 : vector<8x1xf32> to vector<8x8xf32>
    %130 = arith.subf %126, %129 : vector<8x8xf32>
    %131 = math.exp %130 : vector<8x8xf32>
    %cst_41 = arith.constant dense<0.000000e+00> : vector<8xf32>
    %132 = vector.multi_reduction <add>, %131, %cst_41 [1] : vector<8x8xf32> to vector<8xf32>
    %133 = vector.shape_cast %132 : vector<8xf32> to vector<8x1xf32>
    %134 = tpu.reciprocal %133 {approx = true} : vector<8x1xf32> -> vector<8x1xf32>
    %135 = vector.broadcast %134 : vector<8x1xf32> to vector<8x8xf32>
    %136 = arith.mulf %131, %135 : vector<8x8xf32>
    %cst_42 = arith.constant dense<0.000000e+00> : vector<8x16xf32>
    %137 = tpu.matmul %136, %123, %cst_42 {dimension_numbers = #tpu.dot_dimension_numbers<[1], [0], [0], [1], [0, 0, 1, 1], [], []>} : vector<8x8xf32>, vector<8x16xf32>, vector<8x16xf32> -> vector<8x16xf32>
    %138 = vector.extract_strided_slice %5 {offsets = [0, 0, 0], sizes = [1, 16, 32], strides = [1, 1, 1]} : vector<2x16x32xf32> to vector<1x16x32xf32>
    %139 = vector.shape_cast %138 : vector<1x16x32xf32> to vector<16x32xf32>
    %cst_43 = arith.constant dense<0.000000e+00> : vector<8x32xf32>
    %140 = tpu.matmul %137, %139, %cst_43 {dimension_numbers = #tpu.dot_dimension_numbers<[1], [0], [0], [1], [0, 0, 1, 1], [], []>} : vector<8x16xf32>, vector<16x32xf32>, vector<8x32xf32> -> vector<8x32xf32>
    %141 = arith.addf %102, %140 : vector<8x32xf32>
    %142 = vector.extract_strided_slice %3 {offsets = [1, 0, 0], sizes = [1, 32, 16], strides = [1, 1, 1]} : vector<6x32x16xf32> to vector<1x32x16xf32>
    %143 = vector.shape_cast %142 : vector<1x32x16xf32> to vector<32x16xf32>
    %144 = vector.extract_strided_slice %3 {offsets = [3, 0, 0], sizes = [1, 32, 16], strides = [1, 1, 1]} : vector<6x32x16xf32> to vector<1x32x16xf32>
    %145 = vector.shape_cast %144 : vector<1x32x16xf32> to vector<32x16xf32>
    %146 = vector.extract_strided_slice %3 {offsets = [5, 0, 0], sizes = [1, 32, 16], strides = [1, 1, 1]} : vector<6x32x16xf32> to vector<1x32x16xf32>
    %147 = vector.shape_cast %146 : vector<1x32x16xf32> to vector<32x16xf32>
    %cst_44 = arith.constant dense<0.000000e+00> : vector<8x16xf32>
    %148 = tpu.matmul %100, %143, %cst_44 {dimension_numbers = #tpu.dot_dimension_numbers<[1], [0], [0], [1], [0, 0, 1, 1], [], []>} : vector<8x32xf32>, vector<32x16xf32>, vector<8x16xf32> -> vector<8x16xf32>
    %149 = vector.extract_strided_slice %4 {offsets = [1, 0, 0], sizes = [1, 1, 16], strides = [1, 1, 1]} : vector<6x1x16xf32> to vector<1x1x16xf32>
    %150 = vector.shape_cast %149 : vector<1x1x16xf32> to vector<1x16xf32>
    %151 = vector.broadcast %150 : vector<1x16xf32> to vector<8x16xf32>
    %152 = arith.addf %148, %151 : vector<8x16xf32>
    %cst_45 = arith.constant dense<0.000000e+00> : vector<8x16xf32>
    %153 = tpu.matmul %100, %145, %cst_45 {dimension_numbers = #tpu.dot_dimension_numbers<[1], [0], [0], [1], [0, 0, 1, 1], [], []>} : vector<8x32xf32>, vector<32x16xf32>, vector<8x16xf32> -> vector<8x16xf32>
    %154 = vector.extract_strided_slice %4 {offsets = [3, 0, 0], sizes = [1, 1, 16], strides = [1, 1, 1]} : vector<6x1x16xf32> to vector<1x1x16xf32>
    %155 = vector.shape_cast %154 : vector<1x1x16xf32> to vector<1x16xf32>
    %156 = vector.broadcast %155 : vector<1x16xf32> to vector<8x16xf32>
    %157 = arith.addf %153, %156 : vector<8x16xf32>
    %cst_46 = arith.constant dense<0.000000e+00> : vector<8x16xf32>
    %158 = tpu.matmul %100, %147, %cst_46 {dimension_numbers = #tpu.dot_dimension_numbers<[1], [0], [0], [1], [0, 0, 1, 1], [], []>} : vector<8x32xf32>, vector<32x16xf32>, vector<8x16xf32> -> vector<8x16xf32>
    %159 = vector.extract_strided_slice %4 {offsets = [5, 0, 0], sizes = [1, 1, 16], strides = [1, 1, 1]} : vector<6x1x16xf32> to vector<1x1x16xf32>
    %160 = vector.shape_cast %159 : vector<1x1x16xf32> to vector<1x16xf32>
    %161 = vector.broadcast %160 : vector<1x16xf32> to vector<8x16xf32>
    %162 = arith.addf %158, %161 : vector<8x16xf32>
    %cst_47 = arith.constant 2.500000e-01 : f32
    %163 = vector.broadcast %cst_47 : f32 to vector<8x16xf32>
    %164 = arith.mulf %152, %163 : vector<8x16xf32>
    %cst_48 = arith.constant dense<0.000000e+00> : vector<8x8xf32>
    %165 = tpu.matmul %164, %157, %cst_48 {dimension_numbers = #tpu.dot_dimension_numbers<[1], [1], [0], [0], [0, 0, 1, 0], [], []>} : vector<8x16xf32>, vector<8x16xf32>, vector<8x8xf32> -> vector<8x8xf32>
    %cst_49 = arith.constant dense<0xFF800000> : vector<8xf32>
    %166 = vector.multi_reduction <maximumf>, %165, %cst_49 [1] : vector<8x8xf32> to vector<8xf32>
    %167 = vector.shape_cast %166 : vector<8xf32> to vector<8x1xf32>
    %168 = vector.broadcast %167 : vector<8x1xf32> to vector<8x8xf32>
    %169 = arith.subf %165, %168 : vector<8x8xf32>
    %170 = math.exp %169 : vector<8x8xf32>
    %cst_50 = arith.constant dense<0.000000e+00> : vector<8xf32>
    %171 = vector.multi_reduction <add>, %170, %cst_50 [1] : vector<8x8xf32> to vector<8xf32>
    %172 = vector.shape_cast %171 : vector<8xf32> to vector<8x1xf32>
    %173 = tpu.reciprocal %172 {approx = true} : vector<8x1xf32> -> vector<8x1xf32>
    %174 = vector.broadcast %173 : vector<8x1xf32> to vector<8x8xf32>
    %175 = arith.mulf %170, %174 : vector<8x8xf32>
    %cst_51 = arith.constant dense<0.000000e+00> : vector<8x16xf32>
    %176 = tpu.matmul %175, %162, %cst_51 {dimension_numbers = #tpu.dot_dimension_numbers<[1], [0], [0], [1], [0, 0, 1, 1], [], []>} : vector<8x8xf32>, vector<8x16xf32>, vector<8x16xf32> -> vector<8x16xf32>
    %177 = vector.extract_strided_slice %5 {offsets = [1, 0, 0], sizes = [1, 16, 32], strides = [1, 1, 1]} : vector<2x16x32xf32> to vector<1x16x32xf32>
    %178 = vector.shape_cast %177 : vector<1x16x32xf32> to vector<16x32xf32>
    %cst_52 = arith.constant dense<0.000000e+00> : vector<8x32xf32>
    %179 = tpu.matmul %176, %178, %cst_52 {dimension_numbers = #tpu.dot_dimension_numbers<[1], [0], [0], [1], [0, 0, 1, 1], [], []>} : vector<8x16xf32>, vector<16x32xf32>, vector<8x32xf32> -> vector<8x32xf32>
    %180 = arith.addf %141, %179 : vector<8x32xf32>
    %181 = vector.shape_cast %93 : vector<8x32xf32> to vector<8x1x32xf32>
    %182 = vector.shape_cast %180 : vector<8x32xf32> to vector<8x1x32xf32>
    %183 = tpu.concatenate %181, %182 in 1 : vector<8x1x32xf32>, vector<8x1x32xf32> -> vector<8x2x32xf32>
    %c0_53 = arith.constant 0 : index
    %c0_54 = arith.constant 0 : index
    %c0_55 = arith.constant 0 : index
    %184 = vector.load %arg8[%c0_53, %c0_54, %c0_55] : memref<8x2x32xf32, #tpu.memory_space<vmem>>, vector<8x2x32xf32>
    tpu.vector_store %arg8[%c0_53, %c0_54, %c0_55], %183 {strides = array<i32>} : memref<8x2x32xf32, #tpu.memory_space<vmem>>, vector<8x2x32xf32>,
    return
  }
  func.func @transform_0(%arg0: i32) -> (i32, i32, i32) {
    %c0_i32 = arith.constant 0 : i32
    %c0_i32_0 = arith.constant 0 : i32
    %c0_i32_1 = arith.constant 0 : i32
    %c0_i32_2 = arith.constant 0 : i32
    return %c0_i32, %c0_i32_0, %c0_i32_1 : i32, i32, i32
  }
  func.func @transform_1(%arg0: i32) -> (i32, i32, i32) {
    %c0_i32 = arith.constant 0 : i32
    %c0_i32_0 = arith.constant 0 : i32
    %c0_i32_1 = arith.constant 0 : i32
    %c0_i32_2 = arith.constant 0 : i32
    return %c0_i32, %c0_i32_0, %c0_i32_1 : i32, i32, i32
  }
  func.func @transform_2(%arg0: i32) -> (i32, i32) {
    %c0_i32 = arith.constant 0 : i32
    %c0_i32_0 = arith.constant 0 : i32
    %c0_i32_1 = arith.constant 0 : i32
    return %c0_i32, %c0_i32_0 : i32, i32
  }
  func.func @transform_3(%arg0: i32) -> (i32, i32, i32) {
    %c0_i32 = arith.constant 0 : i32
    %c0_i32_0 = arith.constant 0 : i32
    %c0_i32_1 = arith.constant 0 : i32
    %c0_i32_2 = arith.constant 0 : i32
    return %c0_i32, %c0_i32_0, %c0_i32_1 : i32, i32, i32
  }
  func.func @transform_4(%arg0: i32) -> (i32, i32, i32) {
    %c0_i32 = arith.constant 0 : i32
    %c0_i32_0 = arith.constant 0 : i32
    %c0_i32_1 = arith.constant 0 : i32
    %c0_i32_2 = arith.constant 0 : i32
    return %c0_i32, %c0_i32_0, %c0_i32_1 : i32, i32, i32
  }
  func.func @transform_5(%arg0: i32) -> (i32, i32, i32) {
    %c0_i32 = arith.constant 0 : i32
    %c0_i32_0 = arith.constant 0 : i32
    %c0_i32_1 = arith.constant 0 : i32
    %c0_i32_2 = arith.constant 0 : i32
    return %c0_i32, %c0_i32_0, %c0_i32_1 : i32, i32, i32
  }
  func.func @transform_6(%arg0: i32) -> (i32, i32) {
    %c0_i32 = arith.constant 0 : i32
    %c0_i32_0 = arith.constant 0 : i32
    %c0_i32_1 = arith.constant 0 : i32
    return %c0_i32, %c0_i32_0 : i32, i32
  }
  func.func @transform_7(%arg0: i32) -> (i32, i32, i32) {
    %c0_i32 = arith.constant 0 : i32
    %c0_i32_0 = arith.constant 0 : i32
    %c0_i32_1 = arith.constant 0 : i32
    %c0_i32_2 = arith.constant 0 : i32
    return %c0_i32, %c0_i32_0, %c0_i32_1 : i32, i32, i32
  }
}

</mosaic_0001>

<bundles_post_ra>
// kernel: tpu_custom_call.1
= control target key start
LH: loop header
LB: loop body
LE: loop exit
PB: predicated region body
PF: predicated region fallthrough
CT: control target
= control target key end

     0   :  { %vm88_vm0 = vcmask 1041409   ;;  %vm91_vm1 = vcmask 1042434   ;;  %vm94_vm2 = vcmask 1043459   ;;  %vm97_vm3 = vcmask 1044484   ;;  %s1513_s0 = inlined_call_operand.vmem [shape: f32[8,2,16], index: 0, kind: input, shape index: {}]   ;;  %s1514_s1 = inlined_call_operand.vmem [shape: f32[8,2,16], index: 1, kind: input, shape index: {}]   ;;  %s1515_s2 = inlined_call_operand.vmem [shape: f32[1,32], index: 2, kind: input, shape index: {}]   ;;  %s1516_s3 = inlined_call_operand.vmem [shape: f32[6,32,16], index: 3, kind: input, shape index: {}]   ;;  %s1517_s4 = inlined_call_operand.vmem [shape: f32[6,1,16], index: 4, kind: input, shape index: {}]   ;;  %s1518_s5 = inlined_call_operand.vmem [shape: f32[2,16,32], index: 5, kind: input, shape index: {}]   ;;  %s1519_s6 = inlined_call_operand.vmem [shape: f32[1,32], index: 6, kind: input, shape index: {}]   ;;  %s1520_s7 = inlined_call_operand.hbm [shape: f32[8,2,32], index: 7, kind: output, shape index: {}]  }
   0x1   :  { %v1004_v0 = vld [vmem:[%s1514_s1] sm:$0x3]  ;;  %v1009_v1 = vld [vmem:[%s1514_s1 + $0x2] sm:$0x3]  ;;  %v1014_v2 = vld [vmem:[%s1514_s1 + $0x4] sm:$0x3] }
   0x2   :  { %v1019_v3 = vld [vmem:[%s1514_s1 + $0x6] sm:$0x3]  ;;  %v1024_v4 = vld [vmem:[%s1514_s1 + $0x8] sm:$0x3]  ;;  %v1029_v5 = vld [vmem:[%s1514_s1 + $0xa] sm:$0x3] }
   0x3   :  { %v1034_v6 = vld [vmem:[%s1514_s1 + $0xc] sm:$0x3]  ;;  %v1039_v7 = vld [vmem:[%s1514_s1 + $0xe] sm:$0x3]  ;;  %v1044_v8 = vld [vmem:[%s1516_s3 + $0x18] sm:$0xff]  ;;  %v117_v9 = vrot.slane %v1009_v1, 7 }
   0x4   :  { %v119_v10 = vrot.slane %v1014_v2, 6  ;;  %v121_v11 = vrot.slane %v1019_v3, 5  ;;  %163 = vmatpush.msra.mxu0 %v1044_v8  ;;  %v1053_v12 = vld [vmem:[%s1516_s3 + $0x58] sm:$0xff]  ;;  %vm100_vm4 = vcmask 1045509   ;;  %vm103_vm5 = vcmask 1046534   ;;  %v1066_v15 = vld [vmem:[%s1516_s3 + $0x10] sm:$0xff] }
   0x5   :  { %v1058_v13 = vld [vmem:[%s1516_s3 + $0x98] sm:$0xff]  ;;  %v123_v14 = vrot.slane %v1024_v4, 4  ;;  %186 = vmatpush.msra.mxu1 %v1053_v12  ;;  %v1071_v16 = vld [vmem:[%s1516_s3 + $0x50] sm:$0xff]  ;;  %v118_v17 = vsel %vm88_vm0, %v117_v9, %v1004_v0  ;;  %v125_v18 = vrot.slane %v1029_v5, 3  ;;  %v127_v19 = vrot.slane %v1034_v6, 2 }
   0x6   :  { %209 = vmatpush.msra.mxu2 %v1058_v13  ;;  %v129_v20 = vrot.slane %v1039_v7, 1  ;;  %164 = vmatpush.msra.mxu0 %v1066_v15  ;;  %v1084_v21 = vld [vmem:[%s1516_s3 + $0x90] sm:$0xff]  ;;  %v120_v22 = vsel %vm91_vm1, %v119_v10, %v118_v17  ;;  %vm106_vm6 = vcmask 1047559  }
   0x7   :  { %187 = vmatpush.msra.mxu1 %v1071_v16  ;;  %v122_v23 = vsel %vm94_vm2, %v121_v11, %v120_v22 }
   0x8   :  { %210 = vmatpush.msra.mxu2 %v1084_v21  ;;  %v124_v24 = vsel %vm97_vm3, %v123_v14, %v122_v23 }
   0x9   :  { %12 = vsyncpa [#allocation3], 0  ;;  %v126_v25 = vsel %vm100_vm4, %v125_v18, %v124_v24  ;;  %s957_s28 = smov 16   ;;  %v1110_v28 = vld [vmem:[%s1516_s3 + $0x8] sm:$0xff]  ;;  %v1128_v31 = vld [vmem:[%s1516_s3] sm:$0xff]  ;;  %vm134_vm7 = vcmask 130048  }
   0xa   :  { %v128_v26 = vsel %vm103_vm5, %v127_v19, %v126_v25  ;;  %v1115_v29 = vld [vmem:[%s1516_s3 + $0x48] sm:$0xff]  ;;  %165 = vmatpush.msra.mxu0 %v1110_v28  ;;  %v1133_v32 = vld [vmem:[%s1516_s3 + $0x40] sm:$0xff]  ;;  %v1151_v35 = vld [vmem:[%s1516_s3 + $0x38] sm:$0xff]  ;;  %vm147_vm8 = vcmask 261120   ;;  %vm244_vm9 = vcmask 64512   ;;  %vm485_vm10 = vcmask 1046528  }
   0xb   :  { %v130_v27 = vsel %vm106_vm6, %v129_v20, %v128_v26  ;;  %v1120_v30 = vld [vmem:[%s1516_s3 + $0x88] sm:$0xff]  ;;  %188 = vmatpush.msra.mxu1 %v1115_v29  ;;  %v1138_v33 = vld [vmem:[%s1516_s3 + $0x80] sm:$0xff]  ;;  %v1156_v36 = vld [vmem:[%s1516_s3 + $0x78] sm:$0xff]  ;;  %vm839_vm11 = vcmask 1040384   ;;  %vm848_vm12 = vcmask 254976   ;;  %s863_s8 = sshll.u32 %s1520_s7, 4  ;;  %s864_s8 = int_to_ptr.hbm [resolvable:$true] %s863_s8 }
   0xc   :  { %131 = vrot.lane.b32.xlu0 %v130_v27, %s957_s28  ;;  %211 = vmatpush.msra.mxu2 %v1120_v30  ;;  %v1145_v34 = vld [vmem:[%s1513_s0 + $0x2] sm:$0x3]  ;;  %v1161_v37 = vld [vmem:[%s1516_s3 + $0x30] sm:$0xff]  ;;  %v1173_v39 = vld [vmem:[%s1516_s3 + $0x28] sm:$0xff]  ;;  %s959_s9 = smov 32   ;;  %s960_s10 = smov 2  }
   0xd   :  { %166 = vmatpush.msra.mxu0 %v1128_v31  ;;  %189 = vmatpush.msra.mxu1 %v1133_v32  ;;  %v1168_v38 = vld [vmem:[%s1516_s3 + $0x70] sm:$0xff]  ;;  %v1178_v40 = vld [vmem:[%s1516_s3 + $0x68] sm:$0xff]  ;;  %v1183_v41 = vld [vmem:[%s1513_s0 + $0x4] sm:$0x3]  ;;  %v87_v42 = vrot.slane %v1145_v34, 7 }
   0xe   :  { %212 = vmatpush.msra.mxu2 %v1138_v33  ;;  %v1191_v43 = vld [vmem:[%s1513_s0] sm:$0x3]  ;;  %v1208_v46 = vld [vmem:[%s1513_s0 + $0x6] sm:$0x3]  ;;  %v90_v47 = vrot.slane %v1183_v41, 6  ;;  %v1278_v25 = vld [vmem:[%s1518_s5 + $0x8] sm:$0xff] }
   0xf   :  { %318 = vmatpush.msrb.mxu1 %v1151_v35  ;;  %v1196_v44 = vld [vmem:[%s1516_s3 + $0x20] sm:$0xff]  ;;  %v89_v48 = vsel %vm88_vm0, %v87_v42, %v1191_v43  ;;  %v1220_v49 = vld [vmem:[%s1513_s0 + $0x8] sm:$0x3]  ;;  %v1525_v50 = vrot.slane %v1208_v46, 5  ;;  %v1229_v52 = vld [vmem:[%s1513_s0 + $0xa] sm:$0x3]  ;;  %296 = vmatpush.msrb.mxu0 %v1278_v25  ;;  %v457_v1 = vsel %vm91_vm1, %v87_v42, %v1191_v43 }
  0x10   :  { %341 = vmatpush.msrb.mxu2 %v1156_v36  ;;  %v1201_v45 = vld [vmem:[%s1516_s3 + $0x60] sm:$0xff]  ;;  %v92_v51 = vsel %vm91_vm1, %v90_v47, %v89_v48  ;;  %v1524_v53 = vrot.slane %v1220_v49, 4  ;;  %v1238_v55 = vld [vmem:[%s1513_s0 + $0xc] sm:$0x3]  ;;  %v1523_v56 = vrot.slane %v1229_v52, 3  ;;  %v458_v2 = vsel %vm94_vm2, %v90_v47, %v457_v1  ;;  %v77_v3 = vld [vmem:[%s1518_s5 + $0x18] sm:$0xff] }
  0x11   :  { %319 = vmatpush.msrb.mxu1 %v1161_v37  ;;  %v95_v54 = vsel %vm94_vm2, %v1525_v50, %v92_v51  ;;  %v1247_v58 = vld [vmem:[%s1513_s0 + $0xe] sm:$0x3]  ;;  %v1521_v59 = vrot.slane %v1238_v55, 2  ;;  %v1260_v63 = vld [vmem:[%s1515_s2] ss:$0 sm:$0xff]  ;;  %v1319_v50 = vld [vmem:[%s1516_s3 + $0xb8] sm:$0xff] }
  0x12   :  { %342 = vmatpush.msrb.mxu2 %v1168_v38  ;;  %v98_v57 = vsel %vm97_vm3, %v1524_v53, %v95_v54  ;;  %v1522_v61 = vrot.slane %v1247_v58, 1  ;;  %v1284_v26 = vld [vmem:[%s1518_s5] sm:$0xff]  ;;  %v1526_v4 = vrot.slane %v1208_v46, 5  ;;  %v1530_v41 = vrot.slane %v1238_v55, 2 }
  0x13   :  { %320 = vmatpush.msrb.mxu1 %v1173_v39  ;;  %v101_v60 = vsel %vm100_vm4, %v1523_v56, %v98_v57  ;;  %297 = vmatpush.msrb.mxu0 %v1284_v26  ;;  %v1290_v27 = vld [vmem:[%s1517_s4] ss:$0 sm:$0xff]  ;;  %v1295_v48 = vld [vmem:[%s1517_s4 + $0x2] ss:$0 sm:$0xff] }
  0x14   :  { %343 = vmatpush.msrb.mxu2 %v1178_v40  ;;  %v104_v62 = vsel %vm103_vm5, %v1521_v59, %v101_v60  ;;  %v459_v5 = vsel %vm97_vm3, %v1526_v4, %v458_v2 }
  0x15   :  { %321 = vmatpush.msrb.mxu1 %v1196_v44  ;;  %v107_v17 = vsel %vm106_vm6, %v1522_v61, %v104_v62 }
  0x16   :  { %344 = vmatpush.msrb.mxu2 %v1201_v45 }
  0x7e   :  { %v132_v22 = vpop.permute.xlu0 %131 }
  0x7f   :  { %v1266_v23 = vsel %vm134_vm7, %v107_v17, %v132_v22  ;;  %v1303_v17 = vld [vmem:[%s1517_s4 + $0x4] ss:$0 sm:$0xff] }
  0x80   :  { %v139_v24 = vadd.f32 %v1260_v63, %v1266_v23 }
  0x82   :  { %875 = vmatmul.msk.f32.vlgmr.msra.gmra.mxu0 %vm147_vm8, %v139_v24  ;;  %876 = vmatmul.msk.f32.vlgmr.msra.gmra.mxu1 %vm147_vm8, %v139_v24 }
  0x83   :  { %877 = vmatmul.msk.f32.vlgmr.msra.gmra.mxu2 %vm147_vm8, %v139_v24 }
  0x84   :  { %450 = vmatpush.msra.mxu2 %v77_v3 }
  0x8a   :  { %882 = vmatmul.msk.f32.vlgmr.msrb.gmra.mxu1 %vm147_vm8, %v139_v24 }
  0x8b   :  { %883 = vmatmul.msk.f32.vlgmr.msrb.gmra.mxu2 %vm147_vm8, %v139_v24 }
  0xff   :  { %v168_v51 = vpop.f32.mrf.mxu0  ;;  %v191_v54 = vpop.f32.mrf.mxu1 }
 0x100   :  { %v169_v57 = vadd.f32 %v1290_v27, %v168_v51  ;;  %v192_v60 = vadd.f32 %v1295_v48, %v191_v54  ;;  %v1310_v51 = vld [vmem:[%s1517_s4 + $0x3] ss:$0 sm:$0xff] }
 0x102   :  { %v217_v62 = vmul.f32 0.25, %v169_v57  ;;  %878 = vmatpush.xpose.msk.msra.mxu3 %vm134_vm7, %v192_v60 }
 0x105   :  { %879 = vmatmul.msk.f32.vlgmr.msra.gmra.mxu3 %vm134_vm7, %v217_v62 }
 0x106   :  { %v214_v22 = vpop.f32.mrf.mxu2 }
 0x107   :  { %v215_v59 = vadd.f32 %v1303_v17, %v214_v22 }
 0x109   :  { %274 = vmatpush.msrb.mxu3 %v215_v59 }
 0x10b   :  { %364 = vmatpush.msra.mxu3 %v1319_v50 }
 0x10e   :  { %v346_v54 = vpop.f32.mrf.mxu2 }
 0x10f   :  { %v347_v57 = vadd.f32 %v1310_v51, %v346_v54  ;;  %v1324_v54 = vld [vmem:[%s1516_s3 + $0xb0] sm:$0xff] }
 0x110   :  { %365 = vmatpush.msra.mxu3 %v1324_v54 }
 0x111   :  { %885 = vmatpush.xpose.msk.msra.mxu0 %vm134_vm7, %v347_v57 }
 0x188   :  { %v241_v60 = vpop.f32.mrf.mxu3 }
 0x189   :  { %v245_v61 = vsel %vm244_vm9, %v241_v60, -inf }
 0x18a   :  { %246 = vmax.xlane.f32.xlu0 %v245_v61 }
 0x1fd   :  { %v247_v62 = vpop.xlane.xlu0 %246 }
 0x1fe   :  { %v248_v56 = vsub.f32 %v241_v60, %v247_v62  ;;  %v1349_v62 = vld [vmem:[%s1517_s4 + $0x1] ss:$0 sm:$0xff] }
 0x200   :  { %v249_v53 = vmul.f32 1.442695, %v248_v56  ;;  %v1336_v56 = vld [vmem:[%s1516_s3 + $0xa0] sm:$0xff] }
 0x202   :  { %915 = vpow2.f32 %v249_v53  ;;  %v1330_v53 = vld [vmem:[%s1516_s3 + $0xa8] sm:$0xff] }
 0x203   :  { %366 = vmatpush.msra.mxu3 %v1330_v53 }
 0x205   :  { %367 = vmatpush.msra.mxu3 %v1336_v56 }
 0x208   :  { %v916_v59 = vpop.eup %915 }
 0x209   :  { %v251_v22 = vsel %vm244_vm9, %v916_v59, 0.0 }
 0x20a   :  { %252 = vadd.xlane.f32.xlu1 %v251_v22  ;;  %v323_v22 = vpop.f32.mrf.mxu1 }
 0x27d   :  { %v253_v61 = vpop.xlane.xlu1 %252 }
 0x27e   :  { %917 = vrcp.f32 %v253_v61 }
 0x284   :  { %v918_v57 = vpop.eup %917 }
 0x285   :  { %v255_v60 = vmul.f32 %v918_v57, %v916_v59 }
 0x287   :  { %880 = vmatmul.msk.f32.vlgmr.msrb.gmra.mxu3 %vm244_vm9, %v255_v60 }
 0x288   :  { %503 = vmatpush.msrb.mxu3 %v1044_v8  ;;  %v324_v8 = vadd.f32 %v1349_v62, %v323_v22 }
 0x28a   :  { %504 = vmatpush.msrb.mxu3 %v1066_v15  ;;  %v1358_v15 = vld [vmem:[%s1517_s4 + $0x5] ss:$0 sm:$0xff] }
 0x28c   :  { %505 = vmatpush.msrb.mxu3 %v1110_v28  ;;  %v372_v28 = vmul.f32 0.25, %v324_v8 }
 0x28e   :  { %506 = vmatpush.msrb.mxu3 %v1128_v31 }
 0x28f   :  { %884 = vmatmul.msk.f32.vlgmr.msra.gmra.mxu3 %vm147_vm8, %v139_v24 }
 0x30a   :  { %v276_v61 = vpop.f32.mrf.mxu3 }
 0x30b   :  { %881 = vmatmul.msk.f32.vlgmr.msrb.gmra.mxu0 %vm134_vm7, %v276_v61 }
 0x30c   :  { %523 = vmatpush.msrb.mxu0 %v1053_v12  ;;  %v1373_v12 = vld [vmem:[%s1519_s6] ss:$0 sm:$0xff] }
 0x30e   :  { %524 = vmatpush.msrb.mxu0 %v1071_v16  ;;  %v143_v16 = vadd.f32 %v1373_v12, %v1266_v23  ;;  %v465_v23 = vsel %vm91_vm1, %v117_v9, %v1004_v0  ;;  %v1527_v9 = vrot.slane %v1220_v49, 4 }
 0x30f   :  { %v466_v57 = vsel %vm94_vm2, %v119_v10, %v465_v23 }
 0x310   :  { %525 = vmatpush.msrb.mxu0 %v1115_v29  ;;  %v467_v7 = vsel %vm97_vm3, %v121_v11, %v466_v57  ;;  %v460_v10 = vsel %vm100_vm4, %v1527_v9, %v459_v5 }
 0x312   :  { %v369_v31 = vpop.f32.mrf.mxu3  ;;  %526 = vmatpush.msrb.mxu0 %v1133_v32 }
 0x313   :  { %v370_v24 = vadd.f32 %v1358_v15, %v369_v31  ;;  %886 = vmatmul.msk.f32.vlgmr.msra.gmra.mxu0 %vm134_vm7, %v372_v28 }
 0x314   :  { %629 = vmatpush.msra.mxu0 %v1278_v25 }
 0x315   :  { %428 = vmatpush.msra.mxu1 %v370_v24 }
 0x316   :  { %630 = vmatpush.msra.mxu0 %v1284_v26 }
 0x317   :  { %543 = vmatpush.msrb.mxu1 %v1058_v13 }
 0x319   :  { %544 = vmatpush.msrb.mxu1 %v1084_v21 }
 0x31b   :  { %545 = vmatpush.msrb.mxu1 %v1120_v30 }
 0x31d   :  { %546 = vmatpush.msrb.mxu1 %v1138_v33 }
 0x388   :  { %v299_v29 = vpop.f32.mrf.mxu0 }
 0x389   :  { %v1377_v32 = vadd.f32 %v299_v29, %v143_v16 }
 0x390   :  { %v396_v13 = vpop.f32.mrf.mxu0 }
 0x391   :  { %v399_v25 = vsel %vm244_vm9, %v396_v13, -inf }
 0x392   :  { %400 = vmax.xlane.f32.xlu1 %v399_v25 }
 0x3ab   :  { %473 = vrot.lane.b32.xlu1 %v129_v20, %s957_s28  ;;  %v468_v20 = vsel %vm100_vm4, %v123_v14, %v467_v7  ;;  %v1528_v14 = vrot.slane %v1229_v52, 3 }
 0x3ac   :  { %v469_v60 = vsel %vm103_vm5, %v125_v18, %v468_v20 }
 0x3ad   :  { %v470_v0 = vsel %vm106_vm6, %v127_v19, %v469_v60  ;;  %v461_v18 = vsel %vm103_vm5, %v1528_v14, %v460_v10  ;;  %v1529_v19 = vrot.slane %v1247_v58, 1 }
 0x3ae   :  { %v462_v42 = vsel %vm106_vm6, %v1530_v41, %v461_v18 }
 0x405   :  { %v401_v21 = vpop.xlane.xlu1 %400 }
 0x406   :  { %v402_v30 = vsub.f32 %v396_v13, %v401_v21 }
 0x408   :  { %v403_v33 = vmul.f32 1.442695, %v402_v30 }
 0x40a   :  { %919 = vpow2.f32 %v403_v33 }
 0x410   :  { %v920_v26 = vpop.eup %919 }
 0x411   :  { %v405_v59 = vsel %vm244_vm9, %v920_v26, 0.0 }
 0x412   :  { %406 = vadd.xlane.f32.xlu2 %v405_v59 }
 0x41d   :  { %v474_v11 = vpop.permute.xlu1 %473 }
 0x41e   :  { %v1426_v34 = vsel %vm134_vm7, %v1529_v19, %v474_v11 }
 0x41f   :  { %v480_v43 = vadd.f32 %v1260_v63, %v1426_v34  ;;  %v482_v23 = vadd.f32 %v1373_v12, %v1426_v34 }
 0x421   :  { %v487_v58 = vrot.slane %v480_v43, 1 }
 0x42a   :  { %471 = vrot.lane.b32.xlu2 %v470_v0, %s957_s28 }
 0x485   :  { %v407_v6 = vpop.xlane.xlu2 %406 }
 0x486   :  { %921 = vrcp.f32 %v407_v6 }
 0x48c   :  { %v922_v46 = vpop.eup %921 }
 0x48d   :  { %v409_v47 = vmul.f32 %v922_v46, %v920_v26  ;;  %v472_v49 = vpop.permute.xlu2 %471 }
 0x48e   :  { %v1434_v22 = vsel %vm134_vm7, %v462_v42, %v472_v49 }
 0x48f   :  { %v479_v52 = vadd.f32 %v1260_v63, %v1434_v22  ;;  %887 = vmatmul.msk.f32.vlgmr.msra.gmra.mxu1 %vm244_vm9, %v409_v47  ;;  %v481_v59 = vadd.f32 %v1373_v12, %v1434_v22 }
 0x490   :  { %652 = vmatpush.msra.mxu1 %v1151_v35  ;;  %v76_v35 = vld [vmem:[%s1518_s5 + $0x10] sm:$0xff]  ;;  %s958_s5 = smov [#allocation2]  }
 0x491   :  { %v486_v55 = vrot.slane %v479_v52, 1  ;;  %451 = vmatpush.msra.mxu2 %v76_v35  ;;  %s861_s2 = sshll.u32 %s958_s5, 4  ;;  %s862_s2 = int_to_ptr.vmem [resolvable:$true] %s861_s2 }
 0x492   :  { %653 = vmatpush.msra.mxu1 %v1161_v37 }
 0x493   :  { %v488_v61 = vsel %vm485_vm10, %v486_v55, %v487_v58 }
 0x494   :  { %889 = vmatmul.msk.f32.vlgmr.msrb.gmra.mxu3 %vm147_vm8, %v488_v61  ;;  %890 = vmatmul.msk.f32.vlgmr.msrb.gmra.mxu0 %vm147_vm8, %v488_v61 }
 0x495   :  { %654 = vmatpush.msra.mxu1 %v1173_v39 }
 0x497   :  { %891 = vmatmul.msk.f32.vlgmr.msrb.gmra.mxu1 %vm147_vm8, %v488_v61 }
 0x498   :  { %655 = vmatpush.msra.mxu1 %v1196_v44 }
 0x49f   :  { %896 = vmatmul.msk.f32.vlgmr.msra.gmra.mxu1 %vm147_vm8, %v488_v61 }
 0x50c   :  { %v430_v63 = vpop.f32.mrf.mxu1 }
 0x50d   :  { %888 = vmatmul.msk.f32.vlgmr.msra.gmra.mxu2 %vm134_vm7, %v430_v63 }
 0x511   :  { %v528_v37 = vpop.f32.mrf.mxu0 }
 0x512   :  { %v529_v8 = vadd.f32 %v1295_v48, %v528_v37 }
 0x514   :  { %v548_v28 = vpop.f32.mrf.mxu1  ;;  %892 = vmatpush.xpose.msk.msrb.mxu2 %vm134_vm7, %v529_v8 }
 0x515   :  { %v549_v39 = vadd.f32 %v1303_v17, %v548_v28 }
 0x517   :  { %v508_v44 = vpop.f32.mrf.mxu3  ;;  %607 = vmatpush.msra.mxu3 %v549_v39 }
 0x518   :  { %672 = vmatpush.msra.mxu2 %v1156_v36  ;;  %v509_v31 = vadd.f32 %v1290_v27, %v508_v44 }
 0x519   :  { %692 = vmatpush.msrb.mxu3 %v1319_v50 }
 0x51a   :  { %673 = vmatpush.msra.mxu2 %v1168_v38  ;;  %v551_v24 = vmul.f32 0.25, %v509_v31 }
 0x51b   :  { %693 = vmatpush.msrb.mxu3 %v1324_v54 }
 0x51c   :  { %674 = vmatpush.msra.mxu2 %v1178_v40  ;;  %v657_v13 = vpop.f32.mrf.mxu1 }
 0x51d   :  { %893 = vmatmul.msk.f32.vlgmr.msrb.gmra.mxu2 %vm134_vm7, %v551_v24  ;;  %694 = vmatpush.msrb.mxu3 %v1330_v53  ;;  %v658_v25 = vadd.f32 %v1349_v62, %v657_v13 }
 0x51e   :  { %675 = vmatpush.msra.mxu2 %v1201_v45 }
 0x51f   :  { %695 = vmatpush.msrb.mxu3 %v1336_v56  ;;  %v700_v21 = vmul.f32 0.25, %v658_v25 }
 0x520   :  { %778 = vmatpush.msrb.mxu2 %v77_v3 }
 0x522   :  { %779 = vmatpush.msrb.mxu2 %v76_v35 }
 0x525   :  { %897 = vmatmul.msk.f32.vlgmr.msra.gmra.mxu2 %vm147_vm8, %v488_v61 }
 0x590   :  { %v453_v36 = vpop.f32.mrf.mxu2 }
 0x591   :  { %v1466_v38 = vadd.f32 %v453_v36, %v1377_v32 }
 0x593   :  { %v790_v14 = vrot.slane %v1466_v38, 1  ;;  %v791_v18 = vrot.slane %v1466_v38, 2  ;;  %v793_v35 = vrot.slane %v1466_v38, 4  ;;  %v794_v31 = vrot.slane %v1466_v38, 5 }
 0x594   :  { %v795_v36 = vrot.slane %v1466_v38, 6 }
 0x5a0   :  { %v575_v40 = vpop.f32.mrf.mxu2 }
 0x5a1   :  { %v578_v50 = vsel %vm244_vm9, %v575_v40, -inf }
 0x5a2   :  { %579 = vmax.xlane.f32.xlu2 %v578_v50 }
 0x5a8   :  { %v677_v27 = vpop.f32.mrf.mxu2 }
 0x5a9   :  { %v678_v45 = vadd.f32 %v1310_v51, %v677_v27 }
 0x5ab   :  { %899 = vmatpush.xpose.msk.msrb.mxu0 %vm134_vm7, %v678_v45 }
 0x615   :  { %v580_v48 = vpop.xlane.xlu2 %579 }
 0x616   :  { %v581_v17 = vsub.f32 %v575_v40, %v580_v48  ;;  %v796_v48 = vrot.slane %v1466_v38, 7 }
 0x618   :  { %v582_v54 = vmul.f32 1.442695, %v581_v17 }
 0x61a   :  { %923 = vpow2.f32 %v582_v54 }
 0x620   :  { %v924_v53 = vpop.eup %923 }
 0x621   :  { %v584_v56 = vsel %vm244_vm9, %v924_v53, 0.0 }
 0x622   :  { %585 = vadd.xlane.f32.xlu1 %v584_v56 }
 0x695   :  { %v586_v16 = vpop.xlane.xlu1 %585 }
 0x696   :  { %925 = vrcp.f32 %v586_v16 }
 0x69c   :  { %v926_v29 = vpop.eup %925 }
 0x69d   :  { %v588_v32 = vmul.f32 %v926_v29, %v924_v53 }
 0x69f   :  { %894 = vmatmul.msk.f32.vlgmr.msra.gmra.mxu3 %vm244_vm9, %v588_v32 }
 0x6a7   :  { %898 = vmatmul.msk.f32.vlgmr.msrb.gmra.mxu3 %vm147_vm8, %v488_v61  ;;  %v792_v61 = vrot.slane %v1466_v38, 3 }
 0x722   :  { %v609_v51 = vpop.f32.mrf.mxu3 }
 0x723   :  { %895 = vmatmul.msk.f32.vlgmr.msra.gmra.mxu0 %vm134_vm7, %v609_v51 }
 0x72a   :  { %v697_v30 = vpop.f32.mrf.mxu3 }
 0x72b   :  { %v698_v33 = vadd.f32 %v1358_v15, %v697_v30  ;;  %900 = vmatmul.msk.f32.vlgmr.msrb.gmra.mxu0 %vm134_vm7, %v700_v21 }
 0x72d   :  { %756 = vmatpush.msrb.mxu1 %v698_v33 }
 0x7a0   :  { %v632_v26 = vpop.f32.mrf.mxu0 }
 0x7a1   :  { %v636_v57 = vrot.slane %v632_v26, 7 }
 0x7a3   :  { %v638_v7 = vadd.f32 %v636_v57, %v481_v59  ;;  %v639_v20 = vadd.f32 %v636_v57, %v482_v23 }
 0x7a8   :  { %v724_v60 = vpop.f32.mrf.mxu0 }
 0x7a9   :  { %v727_v62 = vsel %vm244_vm9, %v724_v60, -inf }
 0x7aa   :  { %728 = vmax.xlane.f32.xlu0 %v727_v62 }
 0x81d   :  { %v729_v0 = vpop.xlane.xlu0 %728 }
 0x81e   :  { %v730_v1 = vsub.f32 %v724_v60, %v729_v0 }
 0x820   :  { %v731_v15 = vmul.f32 1.442695, %v730_v1 }
 0x822   :  { %927 = vpow2.f32 %v731_v15 }
 0x828   :  { %v928_v2 = vpop.eup %927 }
 0x829   :  { %v733_v3 = vsel %vm244_vm9, %v928_v2, 0.0 }
 0x82a   :  { %734 = vadd.xlane.f32.xlu0 %v733_v3 }
 0x89d   :  { %v735_v4 = vpop.xlane.xlu0 %734 }
 0x89e   :  { %929 = vrcp.f32 %v735_v4 }
 0x8a4   :  { %v930_v5 = vpop.eup %929 }
 0x8a5   :  { %v737_v6 = vmul.f32 %v930_v5, %v928_v2 }
 0x8a7   :  { %901 = vmatmul.msk.f32.vlgmr.msrb.gmra.mxu1 %vm244_vm9, %v737_v6 }
 0x924   :  { %v758_v12 = vpop.f32.mrf.mxu1 }
 0x925   :  { %902 = vmatmul.msk.f32.vlgmr.msrb.gmra.mxu2 %vm134_vm7, %v758_v12 }
 0x9a8   :  { %v781_v9 = vpop.f32.mrf.mxu2 }
 0x9a9   :  { %v785_v10 = vrot.slane %v781_v9, 7 }
 0x9ab   :  { %v787_v11 = vadd.f32 %v785_v10, %v638_v7  ;;  %v788_v42 = vadd.f32 %v785_v10, %v639_v20 }
 0x9ad   :  { %806 = vst [vmem:[#allocation1] sm:$0xff] %v787_v11 }
 0x9b4   :  { %v808_v19 = vld [vmem:[#allocation1 + $0x1] ss:$9 sm:$0xff]  ;;  %v812_v41 = vld [vmem:[#allocation1 + $0x3] ss:$9 sm:$0xff] }
 0x9b5   :  { %v810_v34 = vld [vmem:[#allocation1 + $0x2] ss:$9 sm:$0xff]  ;;  %v814_v43 = vld [vmem:[#allocation1 + $0x4] ss:$9 sm:$0xff]  ;;  %v823_v22 = vperm.slane %v808_v19, 0  ;;  %v825_v58 = vperm.slane %v812_v41, 0 }
 0x9b6   :  { %v816_v46 = vld [vmem:[#allocation1 + $0x5] ss:$9 sm:$0xff]  ;;  %v820_v49 = vld [vmem:[#allocation1 + $0x7] ss:$9 sm:$0xff]  ;;  %v824_v52 = vperm.slane %v810_v34, 0  ;;  %v826_v55 = vperm.slane %v814_v43, 0 }
 0x9b7   :  { %v818_v47 = vld [vmem:[#allocation1 + $0x6] ss:$9 sm:$0xff]  ;;  %v827_v63 = vperm.slane %v816_v46, 0  ;;  %v829_v8 = vperm.slane %v820_v49, 0  ;;  %v840_v28 = vsel %vm839_vm11, %v1466_v38, %v823_v22  ;;  %v842_v44 = vsel %vm839_vm11, %v791_v18, %v825_v58 }
 0x9b8   :  { %821 = vst [vmem:[#allocation1] sm:$0xff] %v788_v42  ;;  %v828_v37 = vperm.slane %v818_v47, 0  ;;  %v841_v39 = vsel %vm839_vm11, %v790_v14, %v824_v52  ;;  %v843_v24 = vsel %vm839_vm11, %v792_v61, %v826_v55 }
 0x9b9   :  { %849 = vst.msk [vmem:[#allocation2] sm:$0x3] %vm848_vm12, %v840_v28  ;;  %v844_v40 = vsel %vm839_vm11, %v793_v35, %v827_v63  ;;  %v846_v27 = vsel %vm839_vm11, %v795_v36, %v829_v8 }
 0x9ba   :  { %850 = vst.msk [vmem:[#allocation2 + $0x2] sm:$0x3] %vm848_vm12, %v841_v39  ;;  %v845_v50 = vsel %vm839_vm11, %v794_v31, %v828_v37 }
 0x9bb   :  { %851 = vst.msk [vmem:[#allocation2 + $0x4] sm:$0x3] %vm848_vm12, %v842_v44 }
 0x9bc   :  { %852 = vst.msk [vmem:[#allocation2 + $0x6] sm:$0x3] %vm848_vm12, %v843_v24 }
 0x9bd   :  { %853 = vst.msk [vmem:[#allocation2 + $0x8] sm:$0x3] %vm848_vm12, %v844_v40 }
 0x9be   :  { %854 = vst.msk [vmem:[#allocation2 + $0xa] sm:$0x3] %vm848_vm12, %v845_v50 }
 0x9bf   :  { %v822_v45 = vld [vmem:[#allocation1] ss:$9 sm:$0xff]  ;;  %855 = vst.msk [vmem:[#allocation2 + $0xc] sm:$0x3] %vm848_vm12, %v846_v27 }
 0x9c0   :  { %v830_v17 = vperm.slane %v822_v45, 0 }
 0x9c2   :  { %v847_v54 = vsel %vm839_vm11, %v796_v48, %v830_v17 }
 0x9c3   :  { %856 = vst.msk [vmem:[#allocation2 + $0xe] sm:$0x3] %vm848_vm12, %v847_v54 }
 0x9c4   :  { %869 = dma.vmem_to_hbm [thread:$0]  %s862_s2, 256, %s864_s8, [#allocation3], %s959_s9, %s959_s9, %s960_s10  }
 0x9c5   :  { %955 = dma.done.wait [#allocation3], 256  }
 0x9c6   :  { %956 = vsyncadd [#allocation3], 4294967040 }
 0x9c7   :  { %874 = vsyncpa [#allocation3], 1 }

</bundles_post_ra>
